<compile_context>
chip_gen: v5e
topology: v5e:2x2
jax: 0.10.0
libtpu: 0.0.40
codegen_flags: <defaults>
</compile_context>

<pallas_src>
import functools

import jax
import jax.numpy as jnp
from jax.experimental import pallas as pl
from jax.experimental.pallas import tpu as pltpu


def _round_up(x: int, m: int) -> int:
    return ((x + m - 1) // m) * m


def _default_hidden_dtype():
    """bf16 hidden/tanh on chips with bf16 VPU/EUP (v6e/v7x), f32 otherwise."""
    try:
        kind = jax.devices()[0].device_kind.lower()
    except Exception:
        return jnp.float32
    for old in ("v2", "v3", "v4", "v5"):
        if old in kind:
            return jnp.float32
    return jnp.bfloat16


def rnn_kernel(xproj_ref, whh_ref, wfc_ref, bfc_ref, out_ref, *, hidden_dtype):
    """One batch-tile of the RNN recurrence + fc epilogue.

    xproj_ref: (S, TB, Hp) bf16 — pre-folded per-step input projections
               (embedding @ W_ih.T + b_ih + b_hh), lane-padded.
    whh_ref  : (Hp, Hp)    bf16
    wfc_ref  : (Hp, Op)    bf16
    bfc_ref  : (1, Op)     f32
    out_ref  : (TB, Op)    f32
    """
    S = xproj_ref.shape[0]
    TB = out_ref.shape[0]
    Hp = whh_ref.shape[0]

    # Recurrent weight loaded once, reused across the whole loop.
    whh = whh_ref[...]

    # Sequential recurrence: only h @ W_hh (MXU) + add + tanh (EUP) per step.
    # Padded hidden columns stay exactly 0 (zero inputs, zero weight cols,
    # tanh(0) == 0).  Padded batch rows compute garbage (token-0 inputs) and are
    # sliced off in the wrapper — never read them here.
    def step(t, h):
        x_t = xproj_ref[t]                                    # (TB, Hp)
        pre = jnp.dot(h.astype(whh.dtype), whh,               # no-op cast if h is bf16
                      preferred_element_type=jnp.float32) + x_t.astype(jnp.float32)
        return jnp.tanh(pre.astype(hidden_dtype))             # bf16 EUP on v6e/v7x

    h0 = jnp.zeros((TB, Hp), hidden_dtype)
    unroll = True if S <= 32 else 8                           # bound code-size blowup
    h_last = jax.lax.fori_loop(0, S, step, h0, unroll=unroll)

    # Epilogue: fc(last hidden) with a lane-dense (Op multiple of 128) store.
    out_ref[...] = (
        jnp.dot(h_last.astype(wfc_ref.dtype), wfc_ref[...],
                preferred_element_type=jnp.float32)
        + bfc_ref[...]
    ).astype(out_ref.dtype)


def prepare_rnn_params(emb_table, w_ih, w_hh, b_ih, b_hh, w_fc, b_fc,
                       *, matmul_dtype=jnp.bfloat16, proj_dtype=jnp.bfloat16):
    """One-time (init) parameter preparation: fold, pad, transpose, cast."""
    V, E = emb_table.shape
    H = w_hh.shape[0]
    O = w_fc.shape[0]
    Hp = _round_up(H, 128)
    Op = _round_up(O, 128)

    # Fold embedding + input projection + both biases into one lookup table (f32).
    emb_proj = emb_table @ w_ih.T + (b_ih + b_hh)[None, :]            # (V, H) f32
    emb_proj_p = jnp.zeros((V, Hp), proj_dtype).at[:, :H].set(emb_proj.astype(proj_dtype))

    whh_p = jnp.zeros((Hp, Hp), matmul_dtype).at[:H, :H].set(w_hh.T.astype(matmul_dtype))
    wfc_p = jnp.zeros((Hp, Op), matmul_dtype).at[:H, :O].set(w_fc.T.astype(matmul_dtype))
    bfc_p = jnp.zeros((1, Op), jnp.float32).at[:, :O].set(b_fc[None, :])

    return {
        "emb_proj": emb_proj_p,   # (V, Hp)
        "whh": whh_p,             # (Hp, Hp)
        "wfc": wfc_p,             # (Hp, Op)
        "bfc": bfc_p,             # (1, Op)
        "hidden_dim": H,
        "out_dim": O,
    }


def rnn_forward(x_ids, params, *, hidden_dtype=None):
    """x_ids: (S, B) int32 token ids. Returns (B, output_dim) f32.

    Matches torch: fc(RNN(Embedding(x)).hidden.squeeze(0)).
    """
    if hidden_dtype is None:
        hidden_dtype = _default_hidden_dtype()

    S, B = x_ids.shape
    emb_proj = params["emb_proj"]
    whh, wfc, bfc = params["whh"], params["wfc"], params["bfc"]
    Hp = whh.shape[0]
    Op = wfc.shape[1]
    O = params["out_dim"]

    # Batch padding: 16 sublanes -> full packed bf16 vreg on the per-step LHS.
    # Batch tiles of <=128 rows form a "parallel" grid axis (megacore on v7x).
    Bp = _round_up(B, 16)
    TB = Bp if Bp <= 128 else 128
    Bp = _round_up(Bp, TB)
    nb = Bp // TB

    # Per-call glue: tiny ids pad + one gather from the already folded/padded table.
    ids_p = jnp.pad(x_ids, ((0, 0), (0, Bp - B)))        # pad with token 0 (rows sliced off)
    xproj = jnp.take(emb_proj, ids_p, axis=0)            # (S, Bp, Hp), bf16, lane-dense

    # VMEM budget (double-buffered blocks) + explicit limit; fail loudly if too big.
    itemsize = jnp.dtype(xproj.dtype).itemsize
    vmem_need = 2 * (
        S * TB * Hp * itemsize
        + Hp * Hp * jnp.dtype(whh.dtype).itemsize
        + Hp * Op * jnp.dtype(wfc.dtype).itemsize
        + Op * 4
        + TB * Op * 4
    )
    assert vmem_need <= 56 * (1 << 20), (
        f"RNN kernel needs ~{vmem_need >> 20} MiB VMEM; add a time-tiled fallback "
        "(Buffered BlockSpec over S) before scaling S*B this large."
    )
    vmem_limit = int(min(max(vmem_need + (4 << 20), 32 << 20), 64 << 20))

    kernel = functools.partial(rnn_kernel, hidden_dtype=hidden_dtype)

    out_pad = pl.pallas_call(
        kernel,
        out_shape=jax.ShapeDtypeStruct((Bp, Op), jnp.float32),
        grid_spec=pltpu.PrefetchScalarGridSpec(
            num_scalar_prefetch=0,
            grid=(nb,),
            in_specs=[
                pl.BlockSpec((S, TB, Hp), lambda i: (0, i, 0)),   # batch-tiled activations
                pl.BlockSpec((Hp, Hp), lambda i: (0, 0)),         # weights: resident
                pl.BlockSpec((Hp, Op), lambda i: (0, 0)),
                pl.BlockSpec((1, Op), lambda i: (0, 0)),
            ],
            out_specs=pl.BlockSpec((TB, Op), lambda i: (i, 0)),
        ),
        compiler_params=pltpu.CompilerParams(
            dimension_semantics=("parallel",),
            vmem_limit_bytes=vmem_limit,
        ),
    )(xproj, whh, wfc, bfc)

    return out_pad[:B, :O]


def rnn_reference(x_ids, emb_table, w_ih, w_hh, b_ih, b_hh, w_fc, b_fc):
    """Pure-JAX f32 reference matching torch semantics."""
    embedded = jnp.take(emb_table, x_ids, axis=0)  # (S, B, E)
    B = x_ids.shape[1]
    H = w_hh.shape[0]
    h = jnp.zeros((B, H), jnp.float32)

    def step(h, x_t):
        h_new = jnp.tanh(x_t @ w_ih.T + b_ih + h @ w_hh.T + b_hh)
        return h_new, None

    h_last, _ = jax.lax.scan(step, h, embedded)
    return h_last @ w_fc.T + b_fc


if __name__ == "__main__":
    # Small shapes consistent with the module's forward.
    input_dim = 16      # vocab size
    embedding_dim = 32
    hidden_dim = 32
    output_dim = 8
    seq_len = 8
    batch = 4

    key = jax.random.PRNGKey(0)
    k_ids, k_emb, k_wih, k_whh, k_bih, k_bhh, k_wfc, k_bfc = jax.random.split(key, 8)

    x_ids = jax.random.randint(k_ids, (seq_len, batch), 0, input_dim, dtype=jnp.int32)

    # Deterministic parameter init (synthetic, not a checkpoint load).
    emb_table = jax.random.normal(k_emb, (input_dim, embedding_dim), jnp.float32) * 0.1
    w_ih = jax.random.normal(k_wih, (hidden_dim, embedding_dim), jnp.float32) * 0.1
    w_hh = jax.random.normal(k_whh, (hidden_dim, hidden_dim), jnp.float32) * 0.1
    b_ih = jax.random.normal(k_bih, (hidden_dim,), jnp.float32) * 0.1
    b_hh = jax.random.normal(k_bhh, (hidden_dim,), jnp.float32) * 0.1
    w_fc = jax.random.normal(k_wfc, (output_dim, hidden_dim), jnp.float32) * 0.1
    b_fc = jax.random.normal(k_bfc, (output_dim,), jnp.float32) * 0.1

    # Init-time (once): fold + pad + cast the weights.
    params = prepare_rnn_params(emb_table, w_ih, w_hh, b_ih, b_hh, w_fc, b_fc)
    params = jax.block_until_ready(params)

    # Forward call: gather + single pallas_call.
    out = rnn_forward(x_ids, params)
    out = jax.block_until_ready(out)

    ref = rnn_reference(x_ids, emb_table, w_ih, w_hh, b_ih, b_hh, w_fc, b_fc)
    assert out.shape == (batch, output_dim)
    # bf16 matmul operands / folded-projection rounding with f32 accumulation
    # -> differences at the ~1e-3 level.
    assert jnp.allclose(out, ref, atol=1e-2, rtol=1e-2), (out, ref)

    print("KERNEL_OK")
</pallas_src>

<mosaic_0001>
module attributes {stable_mosaic.version = 11 : i64} {
  func.func @rnn_kernel(%arg0: i32, %arg1: memref<8x16x128xbf16, #tpu.memory_space<vmem>>, %arg2: memref<128x128xbf16, #tpu.memory_space<vmem>>, %arg3: memref<128x128xbf16, #tpu.memory_space<vmem>>, %arg4: memref<1x128xf32, #tpu.memory_space<vmem>>, %arg5: memref<16x128xf32, #tpu.memory_space<vmem>>) attributes {dimension_semantics = [#tpu.dimension_semantics<parallel>], iteration_bounds = array<i64: 1>, scalar_prefetch = 0 : i64, scratch_operands = 0 : i64, tpu.core_type = #tpu.core_type<tc>, window_params = [{transform_indices = @transform_0, window_bounds = array<i64: 8, 16, 128>}, {pipeline_mode = #tpu.pipeline_mode<synchronous>, transform_indices = @transform_1, window_bounds = array<i64: 128, 128>}, {pipeline_mode = #tpu.pipeline_mode<synchronous>, transform_indices = @transform_2, window_bounds = array<i64: 128, 128>}, {pipeline_mode = #tpu.pipeline_mode<synchronous>, transform_indices = @transform_3, window_bounds = array<i64: 1, 128>}, {transform_indices = @transform_4, window_bounds = array<i64: 16, 128>}]} {
    %c0 = arith.constant 0 : index
    %c0_0 = arith.constant 0 : index
    %0 = vector.load %arg2[%c0, %c0_0] : memref<128x128xbf16, #tpu.memory_space<vmem>>, vector<128x128xbf16>
    %cst = arith.constant 0.000000e+00 : bf16
    %1 = vector.broadcast %cst : bf16 to vector<16x128xbf16>
    %c0_i32 = arith.constant 0 : i32
    %2 = arith.index_cast %c0_i32 : i32 to index
    %c0_1 = arith.constant 0 : index
    %c0_2 = arith.constant 0 : index
    %3 = vector.load %arg1[%2, %c0_1, %c0_2] : memref<8x16x128xbf16, #tpu.memory_space<vmem>>, vector<1x16x128xbf16>
    %4 = vector.shape_cast %3 : vector<1x16x128xbf16> to vector<16x128xbf16>
    %cst_3 = arith.constant dense<0.000000e+00> : vector<16x128xf32>
    %5 = tpu.matmul %1, %0, %cst_3 {dimension_numbers = #tpu.dot_dimension_numbers<[1], [0], [0], [1], [0, 0, 1, 1], [], []>} : vector<16x128xbf16>, vector<128x128xbf16>, vector<16x128xf32> -> vector<16x128xf32>
    %6 = arith.extf %4 : vector<16x128xbf16> to vector<16x128xf32>
    %7 = arith.addf %5, %6 : vector<16x128xf32>
    %8 = arith.truncf %7 : vector<16x128xf32> to vector<16x128xbf16>
    %9 = math.tanh %8 : vector<16x128xbf16>
    %c1_i32 = arith.constant 1 : i32
    %10 = arith.index_cast %c1_i32 : i32 to index
    %c0_4 = arith.constant 0 : index
    %c0_5 = arith.constant 0 : index
    %11 = vector.load %arg1[%10, %c0_4, %c0_5] : memref<8x16x128xbf16, #tpu.memory_space<vmem>>, vector<1x16x128xbf16>
    %12 = vector.shape_cast %11 : vector<1x16x128xbf16> to vector<16x128xbf16>
    %cst_6 = arith.constant dense<0.000000e+00> : vector<16x128xf32>
    %13 = tpu.matmul %9, %0, %cst_6 {dimension_numbers = #tpu.dot_dimension_numbers<[1], [0], [0], [1], [0, 0, 1, 1], [], []>} : vector<16x128xbf16>, vector<128x128xbf16>, vector<16x128xf32> -> vector<16x128xf32>
    %14 = arith.extf %12 : vector<16x128xbf16> to vector<16x128xf32>
    %15 = arith.addf %13, %14 : vector<16x128xf32>
    %16 = arith.truncf %15 : vector<16x128xf32> to vector<16x128xbf16>
    %17 = math.tanh %16 : vector<16x128xbf16>
    %c2_i32 = arith.constant 2 : i32
    %18 = arith.index_cast %c2_i32 : i32 to index
    %c0_7 = arith.constant 0 : index
    %c0_8 = arith.constant 0 : index
    %19 = vector.load %arg1[%18, %c0_7, %c0_8] : memref<8x16x128xbf16, #tpu.memory_space<vmem>>, vector<1x16x128xbf16>
    %20 = vector.shape_cast %19 : vector<1x16x128xbf16> to vector<16x128xbf16>
    %cst_9 = arith.constant dense<0.000000e+00> : vector<16x128xf32>
    %21 = tpu.matmul %17, %0, %cst_9 {dimension_numbers = #tpu.dot_dimension_numbers<[1], [0], [0], [1], [0, 0, 1, 1], [], []>} : vector<16x128xbf16>, vector<128x128xbf16>, vector<16x128xf32> -> vector<16x128xf32>
    %22 = arith.extf %20 : vector<16x128xbf16> to vector<16x128xf32>
    %23 = arith.addf %21, %22 : vector<16x128xf32>
    %24 = arith.truncf %23 : vector<16x128xf32> to vector<16x128xbf16>
    %25 = math.tanh %24 : vector<16x128xbf16>
    %c3_i32 = arith.constant 3 : i32
    %26 = arith.index_cast %c3_i32 : i32 to index
    %c0_10 = arith.constant 0 : index
    %c0_11 = arith.constant 0 : index
    %27 = vector.load %arg1[%26, %c0_10, %c0_11] : memref<8x16x128xbf16, #tpu.memory_space<vmem>>, vector<1x16x128xbf16>
    %28 = vector.shape_cast %27 : vector<1x16x128xbf16> to vector<16x128xbf16>
    %cst_12 = arith.constant dense<0.000000e+00> : vector<16x128xf32>
    %29 = tpu.matmul %25, %0, %cst_12 {dimension_numbers = #tpu.dot_dimension_numbers<[1], [0], [0], [1], [0, 0, 1, 1], [], []>} : vector<16x128xbf16>, vector<128x128xbf16>, vector<16x128xf32> -> vector<16x128xf32>
    %30 = arith.extf %28 : vector<16x128xbf16> to vector<16x128xf32>
    %31 = arith.addf %29, %30 : vector<16x128xf32>
    %32 = arith.truncf %31 : vector<16x128xf32> to vector<16x128xbf16>
    %33 = math.tanh %32 : vector<16x128xbf16>
    %c4_i32 = arith.constant 4 : i32
    %34 = arith.index_cast %c4_i32 : i32 to index
    %c0_13 = arith.constant 0 : index
    %c0_14 = arith.constant 0 : index
    %35 = vector.load %arg1[%34, %c0_13, %c0_14] : memref<8x16x128xbf16, #tpu.memory_space<vmem>>, vector<1x16x128xbf16>
    %36 = vector.shape_cast %35 : vector<1x16x128xbf16> to vector<16x128xbf16>
    %cst_15 = arith.constant dense<0.000000e+00> : vector<16x128xf32>
    %37 = tpu.matmul %33, %0, %cst_15 {dimension_numbers = #tpu.dot_dimension_numbers<[1], [0], [0], [1], [0, 0, 1, 1], [], []>} : vector<16x128xbf16>, vector<128x128xbf16>, vector<16x128xf32> -> vector<16x128xf32>
    %38 = arith.extf %36 : vector<16x128xbf16> to vector<16x128xf32>
    %39 = arith.addf %37, %38 : vector<16x128xf32>
    %40 = arith.truncf %39 : vector<16x128xf32> to vector<16x128xbf16>
    %41 = math.tanh %40 : vector<16x128xbf16>
    %c5_i32 = arith.constant 5 : i32
    %42 = arith.index_cast %c5_i32 : i32 to index
    %c0_16 = arith.constant 0 : index
    %c0_17 = arith.constant 0 : index
    %43 = vector.load %arg1[%42, %c0_16, %c0_17] : memref<8x16x128xbf16, #tpu.memory_space<vmem>>, vector<1x16x128xbf16>
    %44 = vector.shape_cast %43 : vector<1x16x128xbf16> to vector<16x128xbf16>
    %cst_18 = arith.constant dense<0.000000e+00> : vector<16x128xf32>
    %45 = tpu.matmul %41, %0, %cst_18 {dimension_numbers = #tpu.dot_dimension_numbers<[1], [0], [0], [1], [0, 0, 1, 1], [], []>} : vector<16x128xbf16>, vector<128x128xbf16>, vector<16x128xf32> -> vector<16x128xf32>
    %46 = arith.extf %44 : vector<16x128xbf16> to vector<16x128xf32>
    %47 = arith.addf %45, %46 : vector<16x128xf32>
    %48 = arith.truncf %47 : vector<16x128xf32> to vector<16x128xbf16>
    %49 = math.tanh %48 : vector<16x128xbf16>
    %c6_i32 = arith.constant 6 : i32
    %50 = arith.index_cast %c6_i32 : i32 to index
    %c0_19 = arith.constant 0 : index
    %c0_20 = arith.constant 0 : index
    %51 = vector.load %arg1[%50, %c0_19, %c0_20] : memref<8x16x128xbf16, #tpu.memory_space<vmem>>, vector<1x16x128xbf16>
    %52 = vector.shape_cast %51 : vector<1x16x128xbf16> to vector<16x128xbf16>
    %cst_21 = arith.constant dense<0.000000e+00> : vector<16x128xf32>
    %53 = tpu.matmul %49, %0, %cst_21 {dimension_numbers = #tpu.dot_dimension_numbers<[1], [0], [0], [1], [0, 0, 1, 1], [], []>} : vector<16x128xbf16>, vector<128x128xbf16>, vector<16x128xf32> -> vector<16x128xf32>
    %54 = arith.extf %52 : vector<16x128xbf16> to vector<16x128xf32>
    %55 = arith.addf %53, %54 : vector<16x128xf32>
    %56 = arith.truncf %55 : vector<16x128xf32> to vector<16x128xbf16>
    %57 = math.tanh %56 : vector<16x128xbf16>
    %c7_i32 = arith.constant 7 : i32
    %58 = arith.index_cast %c7_i32 : i32 to index
    %c0_22 = arith.constant 0 : index
    %c0_23 = arith.constant 0 : index
    %59 = vector.load %arg1[%58, %c0_22, %c0_23] : memref<8x16x128xbf16, #tpu.memory_space<vmem>>, vector<1x16x128xbf16>
    %60 = vector.shape_cast %59 : vector<1x16x128xbf16> to vector<16x128xbf16>
    %cst_24 = arith.constant dense<0.000000e+00> : vector<16x128xf32>
    %61 = tpu.matmul %57, %0, %cst_24 {dimension_numbers = #tpu.dot_dimension_numbers<[1], [0], [0], [1], [0, 0, 1, 1], [], []>} : vector<16x128xbf16>, vector<128x128xbf16>, vector<16x128xf32> -> vector<16x128xf32>
    %62 = arith.extf %60 : vector<16x128xbf16> to vector<16x128xf32>
    %63 = arith.addf %61, %62 : vector<16x128xf32>
    %64 = arith.truncf %63 : vector<16x128xf32> to vector<16x128xbf16>
    %65 = math.tanh %64 : vector<16x128xbf16>
    %c8_i32 = arith.constant 8 : i32
    %c0_25 = arith.constant 0 : index
    %c0_26 = arith.constant 0 : index
    %66 = vector.load %arg3[%c0_25, %c0_26] : memref<128x128xbf16, #tpu.memory_space<vmem>>, vector<128x128xbf16>
    %cst_27 = arith.constant dense<0.000000e+00> : vector<16x128xf32>
    %67 = tpu.matmul %65, %66, %cst_27 {dimension_numbers = #tpu.dot_dimension_numbers<[1], [0], [0], [1], [0, 0, 1, 1], [], []>} : vector<16x128xbf16>, vector<128x128xbf16>, vector<16x128xf32> -> vector<16x128xf32>
    %c0_28 = arith.constant 0 : index
    %c0_29 = arith.constant 0 : index
    %68 = vector.load %arg4[%c0_28, %c0_29] : memref<1x128xf32, #tpu.memory_space<vmem>>, vector<1x128xf32>
    %69 = vector.broadcast %68 : vector<1x128xf32> to vector<16x128xf32>
    %70 = arith.addf %67, %69 : vector<16x128xf32>
    %c0_30 = arith.constant 0 : index
    %c0_31 = arith.constant 0 : index
    %71 = vector.load %arg5[%c0_30, %c0_31] : memref<16x128xf32, #tpu.memory_space<vmem>>, vector<16x128xf32>
    tpu.vector_store %arg5[%c0_30, %c0_31], %70 {strides = array<i32>} : memref<16x128xf32, #tpu.memory_space<vmem>>, vector<16x128xf32>,
    return
  }
  func.func @transform_0(%arg0: i32) -> (i32, i32, i32) {
    %c0_i32 = arith.constant 0 : i32
    %c0_i32_0 = arith.constant 0 : i32
    %c0_i32_1 = arith.constant 0 : i32
    return %c0_i32, %arg0, %c0_i32_0 : i32, i32, i32
  }
  func.func @transform_1(%arg0: i32) -> (i32, i32) {
    %c0_i32 = arith.constant 0 : i32
    %c0_i32_0 = arith.constant 0 : i32
    %c0_i32_1 = arith.constant 0 : i32
    return %c0_i32, %c0_i32_0 : i32, i32
  }
  func.func @transform_2(%arg0: i32) -> (i32, i32) {
    %c0_i32 = arith.constant 0 : i32
    %c0_i32_0 = arith.constant 0 : i32
    %c0_i32_1 = arith.constant 0 : i32
    return %c0_i32, %c0_i32_0 : i32, i32
  }
  func.func @transform_3(%arg0: i32) -> (i32, i32) {
    %c0_i32 = arith.constant 0 : i32
    %c0_i32_0 = arith.constant 0 : i32
    %c0_i32_1 = arith.constant 0 : i32
    return %c0_i32, %c0_i32_0 : i32, i32
  }
  func.func @transform_4(%arg0: i32) -> (i32, i32) {
    %c0_i32 = arith.constant 0 : i32
    %c0_i32_0 = arith.constant 0 : i32
    return %arg0, %c0_i32 : i32, i32
  }
}

</mosaic_0001>

<bundles_post_ra>
// kernel: tpu_custom_call.1
= control target key start
LH: loop header
LB: loop body
LE: loop exit
PB: predicated region body
PF: predicated region fallthrough
CT: control target
= control target key end

     0   :  { %9 = vsyncpa [#allocation3], 0  ;;  %s738_s0 = inlined_call_operand.hbm [shape: bf16[8,16,128], index: 0, kind: input, shape index: {}]   ;;  %s739_s1 = inlined_call_operand.hbm [shape: bf16[128,128], index: 1, kind: input, shape index: {}]   ;;  %s740_s2 = inlined_call_operand.hbm [shape: bf16[128,128], index: 2, kind: input, shape index: {}]   ;;  %s741_s3 = inlined_call_operand.vmem [shape: f32[1,128], index: 3, kind: input, shape index: {}]   ;;  %s742_s4 = inlined_call_operand.hbm [shape: f32[16,128], index: 4, kind: output, shape index: {}]  }
   0x1   :  { %10 = vsyncpa [#allocation6], 0 }
   0x2   :  { %11 = vsyncpa [#allocation4], 0  ;;  %s29_s17 = sshll.u32 %s739_s1, 4  ;;  %s689_s18 = smov [#allocation5]   ;;  %s30_s17 = int_to_ptr.hbm [resolvable:$true] %s29_s17 }
   0x3   :  { %s31_s19 = sshll.u32 %s689_s18, 4  ;;  %s16_s22 = sshll.u32 %s738_s0, 4  ;;  %s32_s19 = int_to_ptr.vmem [resolvable:$true] %s31_s19  ;;  %s17_s22 = int_to_ptr.hbm [resolvable:$true] %s16_s22 }
   0x4   :  { %s690_s23 = smov 64   ;;  %s691_s24 = smov 4  }
   0x5   :  { %37 = dma.hbm_to_vmem [thread:$0]  %s30_s17, 1024, %s32_s19, [#allocation6], %s690_s23, %s690_s23, %s691_s24  }
   0x6   :  { %s692_s25 = smov [#allocation2]   ;;  %s42_s29 = sshll.u32 %s740_s2, 4  ;;  %s43_s29 = int_to_ptr.hbm [resolvable:$true] %s42_s29 }
   0x7   :  { %s18_s26 = sshll.u32 %s692_s25, 4  ;;  %s693_s1 = smov [#allocation7]   ;;  %s19_s26 = int_to_ptr.vmem [resolvable:$true] %s18_s26 }
   0x8   :  { %24 = dma.hbm_to_vmem [thread:$0]  %s17_s22, 1024, %s19_s26, [#allocation3], %s690_s23, %s690_s23, %s691_s24  }
   0x9   :  { %s44_s30 = sshll.u32 %s693_s1, 4  ;;  %s45_s30 = int_to_ptr.vmem [resolvable:$true] %s44_s30 }
   0xa   :  { %50 = dma.hbm_to_vmem [thread:$0]  %s43_s29, 1024, %s45_s30, [#allocation6], %s690_s23, %s690_s23, %s691_s24  }
   0xb   :  { %683 = dma.done.wait [#allocation3], 1024  }
   0xc   :  { %684 = vsyncadd [#allocation3], 4294966272 }
   0xd   :  { %685 = dma.done.wait [#allocation6], 2048  }
   0xe   :  { %686 = vsyncadd [#allocation6], 4294965248  ;;  %v504_v0 = vld [vmem:[#allocation5 + $0x38] sm:$0xff]  ;;  %v503_v1 = vld [vmem:[#allocation5 + $0x30] sm:$0xff]  ;;  %v694_v8 = vmov 0   ;;  %s695_s5 = smov [#allocation8]  }
   0xf   :  { %134 = vmatpush.bf16.msra.mxu0 %v504_v0  ;;  %159 = vmatpush.bf16.msra.mxu1 %v504_v0  ;;  %v502_v2 = vld [vmem:[#allocation5 + $0x28] sm:$0xff]  ;;  %v501_v3 = vld [vmem:[#allocation5 + $0x20] sm:$0xff]  ;;  %v500_v4 = vld [vmem:[#allocation5 + $0x18] sm:$0xff]  ;;  %s417_s6 = sshll.u32 %s695_s5, 4  ;;  %s419_s9 = sshll.u32 %s742_s4, 4  ;;  %s418_s6 = int_to_ptr.vmem [resolvable:$true] %s417_s6  ;;  %s420_s9 = int_to_ptr.hbm [resolvable:$true] %s419_s9 }
  0x10   :  { %184 = vmatpush.bf16.msra.mxu2 %v504_v0  ;;  %209 = vmatpush.bf16.msra.mxu3 %v504_v0  ;;  %v499_v5 = vld [vmem:[#allocation5 + $0x10] sm:$0xff]  ;;  %v498_v6 = vld [vmem:[#allocation5 + $0x8] sm:$0xff]  ;;  %v497_v7 = vld [vmem:[#allocation5] sm:$0xff]  ;;  %s696_s10 = smov 128   ;;  %s697_s11 = smov 8  }
  0x11   :  { %v514_v10 = vld [vmem:[#allocation2] sm:$0xff]   ;;  %v518_v23 = vld [vmem:[#allocation2 + $0x8] sm:$0xff]   ;;  %v522_v36 = vld [vmem:[#allocation2 + $0x10] sm:$0xff]  }
  0x12   :  { %v515_v11 = vunpack.c.l.bf16 %v514_v10  ;;  %v516_v12 = vunpack.c.h.bf16 %v514_v10  ;;  %v519_v24 = vunpack.c.l.bf16 %v518_v23  ;;  %v520_v25 = vunpack.c.h.bf16 %v518_v23  ;;  %v526_v49 = vld [vmem:[#allocation2 + $0x18] sm:$0xff]   ;;  %v530_v62 = vld [vmem:[#allocation2 + $0x20] sm:$0xff]  }
  0x13   :  { %135 = vmatpush.bf16.msra.mxu0 %v503_v1  ;;  %160 = vmatpush.bf16.msra.mxu1 %v503_v1  ;;  %v523_v37 = vunpack.c.l.bf16 %v522_v36  ;;  %v524_v38 = vunpack.c.h.bf16 %v522_v36  ;;  %v527_v50 = vunpack.c.l.bf16 %v526_v49  ;;  %v528_v51 = vunpack.c.h.bf16 %v526_v49  ;;  %v512_v23 = vld [vmem:[#allocation7 + $0x38] sm:$0xff] }
  0x14   :  { %185 = vmatpush.bf16.msra.mxu2 %v503_v1  ;;  %210 = vmatpush.bf16.msra.mxu3 %v503_v1  ;;  %v531_v63 = vunpack.c.l.bf16 %v530_v62 }
  0x17   :  { %136 = vmatpush.bf16.msra.mxu0 %v502_v2  ;;  %161 = vmatpush.bf16.msra.mxu1 %v502_v2 }
  0x18   :  { %186 = vmatpush.bf16.msra.mxu2 %v502_v2  ;;  %211 = vmatpush.bf16.msra.mxu3 %v502_v2 }
  0x1b   :  { %137 = vmatpush.bf16.msra.mxu0 %v501_v3  ;;  %162 = vmatpush.bf16.msra.mxu1 %v501_v3 }
  0x1c   :  { %187 = vmatpush.bf16.msra.mxu2 %v501_v3  ;;  %212 = vmatpush.bf16.msra.mxu3 %v501_v3 }
  0x1f   :  { %138 = vmatpush.bf16.msra.mxu0 %v500_v4  ;;  %163 = vmatpush.bf16.msra.mxu1 %v500_v4 }
  0x20   :  { %188 = vmatpush.bf16.msra.mxu2 %v500_v4  ;;  %213 = vmatpush.bf16.msra.mxu3 %v500_v4 }
  0x23   :  { %139 = vmatpush.bf16.msra.mxu0 %v499_v5  ;;  %164 = vmatpush.bf16.msra.mxu1 %v499_v5 }
  0x24   :  { %189 = vmatpush.bf16.msra.mxu2 %v499_v5  ;;  %214 = vmatpush.bf16.msra.mxu3 %v499_v5 }
  0x27   :  { %140 = vmatpush.bf16.msra.mxu0 %v498_v6  ;;  %165 = vmatpush.bf16.msra.mxu1 %v498_v6 }
  0x28   :  { %190 = vmatpush.bf16.msra.mxu2 %v498_v6  ;;  %215 = vmatpush.bf16.msra.mxu3 %v498_v6 }
  0x2b   :  { %141 = vmatpush.bf16.msra.mxu0 %v497_v7  ;;  %166 = vmatpush.bf16.msra.mxu1 %v497_v7 }
  0x2c   :  { %191 = vmatpush.bf16.msra.mxu2 %v497_v7  ;;  %216 = vmatpush.bf16.msra.mxu3 %v497_v7 }
  0x2e   :  { %142 = vmatmul.bf16.vlgmr.msra.gmra.mxu0 %v694_v8 }
  0x2f   :  { %234 = vmatpush.bf16.msrb.mxu0 %v504_v0  ;;  %259 = vmatpush.bf16.msrb.mxu1 %v504_v0 }
  0x30   :  { %284 = vmatpush.bf16.msrb.mxu2 %v504_v0  ;;  %309 = vmatpush.bf16.msrb.mxu3 %v504_v0  ;;  %v532_v0 = vunpack.c.h.bf16 %v530_v62 }
  0x33   :  { %235 = vmatpush.bf16.msrb.mxu0 %v503_v1  ;;  %260 = vmatpush.bf16.msrb.mxu1 %v503_v1 }
  0x34   :  { %285 = vmatpush.bf16.msrb.mxu2 %v503_v1  ;;  %310 = vmatpush.bf16.msrb.mxu3 %v503_v1 }
  0x37   :  { %236 = vmatpush.bf16.msrb.mxu0 %v502_v2  ;;  %261 = vmatpush.bf16.msrb.mxu1 %v502_v2 }
  0x38   :  { %286 = vmatpush.bf16.msrb.mxu2 %v502_v2  ;;  %311 = vmatpush.bf16.msrb.mxu3 %v502_v2 }
  0x3b   :  { %237 = vmatpush.bf16.msrb.mxu0 %v501_v3  ;;  %262 = vmatpush.bf16.msrb.mxu1 %v501_v3 }
  0x3c   :  { %287 = vmatpush.bf16.msrb.mxu2 %v501_v3  ;;  %312 = vmatpush.bf16.msrb.mxu3 %v501_v3 }
  0x3f   :  { %238 = vmatpush.bf16.msrb.mxu0 %v500_v4  ;;  %263 = vmatpush.bf16.msrb.mxu1 %v500_v4 }
  0x40   :  { %288 = vmatpush.bf16.msrb.mxu2 %v500_v4  ;;  %313 = vmatpush.bf16.msrb.mxu3 %v500_v4 }
  0x43   :  { %239 = vmatpush.bf16.msrb.mxu0 %v499_v5  ;;  %264 = vmatpush.bf16.msrb.mxu1 %v499_v5 }
  0x44   :  { %289 = vmatpush.bf16.msrb.mxu2 %v499_v5  ;;  %314 = vmatpush.bf16.msrb.mxu3 %v499_v5 }
  0x47   :  { %240 = vmatpush.bf16.msrb.mxu0 %v498_v6  ;;  %265 = vmatpush.bf16.msrb.mxu1 %v498_v6 }
  0x48   :  { %290 = vmatpush.bf16.msrb.mxu2 %v498_v6  ;;  %315 = vmatpush.bf16.msrb.mxu3 %v498_v6 }
  0x4b   :  { %241 = vmatpush.bf16.msrb.mxu0 %v497_v7  ;;  %266 = vmatpush.bf16.msrb.mxu1 %v497_v7 }
  0x4c   :  { %291 = vmatpush.bf16.msrb.mxu2 %v497_v7  ;;  %316 = vmatpush.bf16.msrb.mxu3 %v497_v7 }
  0x4f   :  { %397 = vmatpush.bf16.msra.mxu0 %v512_v23 }
  0xab   :  { %v143_v9 = vpop.f32.mrf.mxu0 }
  0xac   :  { %v144_v14 = vadd.f32 %v515_v11, %v143_v9  ;;  %v534_v11 = vld [vmem:[#allocation2 + $0x28] sm:$0xff]  }
  0xb3   :  { %v145_v13 = vpop.f32.mrf.mxu0 }
  0xb4   :  { %v146_v15 = vadd.f32 %v516_v12, %v145_v13  ;;  %v535_v12 = vunpack.c.l.bf16 %v534_v11  ;;  %v536_v13 = vunpack.c.h.bf16 %v534_v11 }
  0xb6   :  { %v148_v16 = vpack.c.bf16 %v146_v15, %v144_v14 }
  0xb8   :  { %v149_v17 = vunpack.c.l.bf16 %v148_v16  ;;  %v150_v18 = vunpack.c.h.bf16 %v148_v16 }
  0xba   :  { %555 = vtanh.f32 %v149_v17 }
  0xbb   :  { %557 = vtanh.f32 %v150_v18 }
  0xc0   :  { %v556_v19 = vpop.eup %555 }
  0xc1   :  { %v558_v20 = vpop.eup %557 }
  0xc2   :  { %v153_v21 = vpack.c.bf16 %v558_v20, %v556_v19 }
  0xc4   :  { %167 = vmatmul.bf16.vlgmr.msra.gmra.mxu1 %v153_v21 }
 0x141   :  { %v168_v22 = vpop.f32.mrf.mxu1 }
 0x142   :  { %v169_v27 = vadd.f32 %v519_v24, %v168_v22  ;;  %v511_v24 = vld [vmem:[#allocation7 + $0x30] sm:$0xff] }
 0x143   :  { %398 = vmatpush.bf16.msra.mxu0 %v511_v24 }
 0x149   :  { %v170_v26 = vpop.f32.mrf.mxu1 }
 0x14a   :  { %v171_v28 = vadd.f32 %v520_v25, %v170_v26  ;;  %v538_v26 = vld [vmem:[#allocation2 + $0x30] sm:$0xff]  }
 0x14c   :  { %v173_v29 = vpack.c.bf16 %v171_v28, %v169_v27  ;;  %v539_v27 = vunpack.c.l.bf16 %v538_v26  ;;  %v540_v28 = vunpack.c.h.bf16 %v538_v26 }
 0x14e   :  { %v174_v30 = vunpack.c.l.bf16 %v173_v29  ;;  %v175_v31 = vunpack.c.h.bf16 %v173_v29 }
 0x150   :  { %559 = vtanh.f32 %v174_v30 }
 0x151   :  { %561 = vtanh.f32 %v175_v31 }
 0x156   :  { %v560_v32 = vpop.eup %559 }
 0x157   :  { %v562_v33 = vpop.eup %561 }
 0x158   :  { %v178_v34 = vpack.c.bf16 %v562_v33, %v560_v32 }
 0x15a   :  { %192 = vmatmul.bf16.vlgmr.msra.gmra.mxu2 %v178_v34 }
 0x1dd   :  { %v193_v35 = vpop.f32.mrf.mxu2 }
 0x1de   :  { %v194_v40 = vadd.f32 %v523_v37, %v193_v35 }
 0x1e5   :  { %v195_v39 = vpop.f32.mrf.mxu2 }
 0x1e6   :  { %v196_v41 = vadd.f32 %v524_v38, %v195_v39  ;;  %v510_v38 = vld [vmem:[#allocation7 + $0x28] sm:$0xff]  ;;  %v509_v39 = vld [vmem:[#allocation7 + $0x20] sm:$0xff] }
 0x1e7   :  { %399 = vmatpush.bf16.msra.mxu0 %v510_v38 }
 0x1e8   :  { %v198_v42 = vpack.c.bf16 %v196_v41, %v194_v40  ;;  %v508_v40 = vld [vmem:[#allocation7 + $0x18] sm:$0xff]  ;;  %v507_v41 = vld [vmem:[#allocation7 + $0x10] sm:$0xff] }
 0x1ea   :  { %v199_v43 = vunpack.c.l.bf16 %v198_v42  ;;  %v200_v44 = vunpack.c.h.bf16 %v198_v42  ;;  %v506_v42 = vld [vmem:[#allocation7 + $0x8] sm:$0xff] }
 0x1eb   :  { %400 = vmatpush.bf16.msra.mxu0 %v509_v39 }
 0x1ec   :  { %563 = vtanh.f32 %v199_v43  ;;  %v505_v43 = vld [vmem:[#allocation7] sm:$0xff] }
 0x1ed   :  { %565 = vtanh.f32 %v200_v44 }
 0x1ef   :  { %401 = vmatpush.bf16.msra.mxu0 %v508_v40 }
 0x1f2   :  { %v564_v45 = vpop.eup %563 }
 0x1f3   :  { %v566_v46 = vpop.eup %565  ;;  %402 = vmatpush.bf16.msra.mxu0 %v507_v41 }
 0x1f4   :  { %v203_v47 = vpack.c.bf16 %v566_v46, %v564_v45  ;;  %v542_v45 = vld [vmem:[#allocation2 + $0x38] sm:$0xff]  }
 0x1f5   :  { %v543_v46 = vunpack.c.l.bf16 %v542_v45 }
 0x1f6   :  { %217 = vmatmul.bf16.vlgmr.msra.gmra.mxu3 %v203_v47  ;;  %v544_v47 = vunpack.c.h.bf16 %v542_v45 }
 0x1f7   :  { %403 = vmatpush.bf16.msra.mxu0 %v506_v42 }
 0x1fb   :  { %404 = vmatpush.bf16.msra.mxu0 %v505_v43 }
 0x279   :  { %v218_v48 = vpop.f32.mrf.mxu3 }
 0x27a   :  { %v219_v53 = vadd.f32 %v527_v50, %v218_v48 }
 0x281   :  { %v220_v52 = vpop.f32.mrf.mxu3 }
 0x282   :  { %v221_v54 = vadd.f32 %v528_v51, %v220_v52 }
 0x284   :  { %v223_v55 = vpack.c.bf16 %v221_v54, %v219_v53 }
 0x286   :  { %v224_v56 = vunpack.c.l.bf16 %v223_v55  ;;  %v225_v57 = vunpack.c.h.bf16 %v223_v55 }
 0x288   :  { %567 = vtanh.f32 %v224_v56 }
 0x289   :  { %569 = vtanh.f32 %v225_v57  ;;  %v554_v57 = vld [vmem:[%s741_s3] ss:$0 sm:$0xff] }
 0x28e   :  { %v568_v58 = vpop.eup %567 }
 0x28f   :  { %v570_v59 = vpop.eup %569 }
 0x290   :  { %v228_v60 = vpack.c.bf16 %v570_v59, %v568_v58 }
 0x292   :  { %242 = vmatmul.bf16.vlgmr.msrb.gmra.mxu0 %v228_v60 }
 0x30f   :  { %v243_v61 = vpop.f32.mrf.mxu0 }
 0x310   :  { %v244_v2 = vadd.f32 %v531_v63, %v243_v61 }
 0x317   :  { %v245_v1 = vpop.f32.mrf.mxu0 }
 0x318   :  { %v246_v3 = vadd.f32 %v532_v0, %v245_v1 }
 0x31a   :  { %v248_v4 = vpack.c.bf16 %v246_v3, %v244_v2 }
 0x31c   :  { %v249_v5 = vunpack.c.l.bf16 %v248_v4  ;;  %v250_v6 = vunpack.c.h.bf16 %v248_v4 }
 0x31e   :  { %571 = vtanh.f32 %v249_v5 }
 0x31f   :  { %573 = vtanh.f32 %v250_v6 }
 0x324   :  { %v572_v7 = vpop.eup %571 }
 0x325   :  { %v574_v8 = vpop.eup %573 }
 0x326   :  { %v253_v9 = vpack.c.bf16 %v574_v8, %v572_v7 }
 0x328   :  { %267 = vmatmul.bf16.vlgmr.msrb.gmra.mxu1 %v253_v9 }
 0x3a5   :  { %v268_v10 = vpop.f32.mrf.mxu1 }
 0x3a6   :  { %v269_v15 = vadd.f32 %v535_v12, %v268_v10 }
 0x3ad   :  { %v270_v14 = vpop.f32.mrf.mxu1 }
 0x3ae   :  { %v271_v16 = vadd.f32 %v536_v13, %v270_v14 }
 0x3b0   :  { %v273_v17 = vpack.c.bf16 %v271_v16, %v269_v15 }
 0x3b2   :  { %v274_v18 = vunpack.c.l.bf16 %v273_v17  ;;  %v275_v19 = vunpack.c.h.bf16 %v273_v17 }
 0x3b4   :  { %575 = vtanh.f32 %v274_v18 }
 0x3b5   :  { %577 = vtanh.f32 %v275_v19 }
 0x3ba   :  { %v576_v20 = vpop.eup %575 }
 0x3bb   :  { %v578_v21 = vpop.eup %577 }
 0x3bc   :  { %v278_v22 = vpack.c.bf16 %v578_v21, %v576_v20 }
 0x3be   :  { %292 = vmatmul.bf16.vlgmr.msrb.gmra.mxu2 %v278_v22 }
 0x441   :  { %v293_v25 = vpop.f32.mrf.mxu2 }
 0x442   :  { %v294_v30 = vadd.f32 %v539_v27, %v293_v25 }
 0x449   :  { %v295_v29 = vpop.f32.mrf.mxu2 }
 0x44a   :  { %v296_v31 = vadd.f32 %v540_v28, %v295_v29 }
 0x44c   :  { %v298_v32 = vpack.c.bf16 %v296_v31, %v294_v30 }
 0x44e   :  { %v299_v33 = vunpack.c.l.bf16 %v298_v32  ;;  %v300_v34 = vunpack.c.h.bf16 %v298_v32 }
 0x450   :  { %579 = vtanh.f32 %v299_v33 }
 0x451   :  { %581 = vtanh.f32 %v300_v34 }
 0x456   :  { %v580_v35 = vpop.eup %579 }
 0x457   :  { %v582_v36 = vpop.eup %581 }
 0x458   :  { %v303_v37 = vpack.c.bf16 %v582_v36, %v580_v35 }
 0x45a   :  { %317 = vmatmul.bf16.vlgmr.msrb.gmra.mxu3 %v303_v37 }
 0x4dd   :  { %v318_v44 = vpop.f32.mrf.mxu3 }
 0x4de   :  { %v319_v49 = vadd.f32 %v543_v46, %v318_v44 }
 0x4e5   :  { %v320_v48 = vpop.f32.mrf.mxu3 }
 0x4e6   :  { %v321_v50 = vadd.f32 %v544_v47, %v320_v48 }
 0x4e8   :  { %v323_v51 = vpack.c.bf16 %v321_v50, %v319_v49 }
 0x4ea   :  { %v324_v52 = vunpack.c.l.bf16 %v323_v51  ;;  %v325_v53 = vunpack.c.h.bf16 %v323_v51 }
 0x4ec   :  { %583 = vtanh.f32 %v324_v52 }
 0x4ed   :  { %585 = vtanh.f32 %v325_v53 }
 0x4f2   :  { %v584_v54 = vpop.eup %583 }
 0x4f3   :  { %v586_v55 = vpop.eup %585 }
 0x4f4   :  { %v328_v56 = vpack.c.bf16 %v586_v55, %v584_v54 }
 0x4f6   :  { %405 = vmatmul.bf16.vlgmr.msra.gmra.mxu0 %v328_v56 }
 0x573   :  { %v406_v58 = vpop.f32.mrf.mxu0 }
 0x574   :  { %v407_v59 = vadd.f32 %v554_v57, %v406_v58 }
 0x576   :  { %411 = vst [vmem:[#allocation8] sm:$0xff] %v407_v59 }
 0x57b   :  { %v408_v60 = vpop.f32.mrf.mxu0 }
 0x57c   :  { %v409_v61 = vadd.f32 %v554_v57, %v408_v60 }
 0x57e   :  { %412 = vst [vmem:[#allocation8 + $0x8] sm:$0xff] %v409_v61 }
 0x57f   :  { %425 = dma.vmem_to_hbm [thread:$0]  %s418_s6, 256, %s420_s9, [#allocation4], %s696_s10, %s696_s10, %s697_s11  }
 0x580   :  { %687 = dma.done.wait [#allocation4], 256  }
 0x581   :  { %688 = vsyncadd [#allocation4], 4294967040 }
 0x582   :  { %430 = vsyncpa [#allocation3], 1 }
 0x583   :  { %431 = vsyncpa [#allocation6], 1 }
 0x584   :  { %432 = vsyncpa [#allocation4], 1 }

</bundles_post_ra>
